<compile_context>
chip_gen: v7x
topology: tpu7x:2x2x1
jax: 0.10.0
libtpu: 0.0.40
codegen_flags: <defaults>
</compile_context>

<pallas_src>
import functools

import jax
import jax.numpy as jnp
from jax.experimental import pallas as pl
from jax.experimental.pallas import tpu as pltpu

# ---- packed bf16 weight-slab row layout (all blocks 8-row aligned, lane offset 0) ----
_H2_W   = 0     # (16, 8)  head Linear(16,8).T
_STEM_W = 16    # (8, 4)   stem 3x3 conv folded to its interior 2x2 taps
_PF_W   = 24    # (4, 16)  [proj 1x1 | f0 1x1] lane-concatenated
_F1_W   = 32    # (8, 8)   f[1] grouped 3x3 conv centre taps, block-diagonal
_SE1_W  = 40    # (8, 2)   f[2] squeeze conv
_SE2_W  = 48    # (2, 8)   f[2] excite conv
_F3_W   = 56    # (8, 8)   f[3] 1x1 conv
_H1_W   = 64    # (8, 32)  [head Linear(16,16).T rows 0:8 | rows 8:16]
_H3_W   = 72    # (8, 16)  head Linear(8,15).T zero-padded to 16 lanes
_W_ROWS = 80

# ---- f32 BN slab: row 0 = gamma, row 1 = beta, per-BN lane offsets ----
_BN_STEM, _BN_PROJ, _BN_F0, _BN_F1, _BN_F4 = 0, 8, 16, 24, 32
_BN_LANES = 64

_EPS = 1e-5


# ----------------------------- fused Pallas kernel -----------------------------

def _fused_forward_kernel(x_ref, w_ref, bn_ref, o_ref, *, eps):
    def w(row, rows, cols):                       # bf16 weight window
        return w_ref[row:row + rows, 0:cols]

    def mm(a, b):                                 # bf16 operands, f32 accumulation
        return jnp.dot(a.astype(jnp.bfloat16), b, preferred_element_type=jnp.float32)

    def bn(y, off, relu):
        # batch-of-2 train-mode BN, gamma folded into the rsqrt scale (all f32 / VPU+EUP)
        c = y.shape[1]
        g = bn_ref[0:1, off:off + c]
        b = bn_ref[1:2, off:off + c]
        m = 0.5 * (y[0:1, :] + y[1:2, :])
        d = y - m
        v = 0.5 * (d[0:1, :] * d[0:1, :] + d[1:2, :] * d[1:2, :])
        s = g * jax.lax.rsqrt(v + eps)
        out = d * s + b
        return jnp.maximum(out, 0.0) if relu else out

    x = x_ref[0]                                          # (2, 8) = (N, Cin*H*W), f32

    # trunk.stem: Conv2d(2,4,3x3,s=2,p=1) -> BN -> ReLU   (1x1 output spatial)
    y = bn(mm(x, w(_STEM_W, 8, 4)), _BN_STEM, relu=True)  # (2, 4)

    # ResBlock: proj and f[0] 1x1 convs fused into one matmul, then split by lanes
    pf = mm(y, w(_PF_W, 4, 16))                           # (2, 16)
    left = bn(pf[:, 0:8], _BN_PROJ, relu=False)           # bn(proj(x))
    z = bn(pf[:, 8:16], _BN_F0, relu=True)                # f[0]: conv + BN + ReLU

    # f[1]: grouped 3x3 conv (centre tap only at 1x1 spatial) + BN + ReLU
    z = bn(mm(z, w(_F1_W, 8, 8)), _BN_F1, relu=True)      # (2, 8)
    # f[2]: AdaptiveAvgPool2d(1) is identity at 1x1, then Conv(8->2)+ReLU, Conv(2->8)+Sigmoid
    #       (plain Sequential: output replaces the feature map)
    s = jnp.maximum(mm(z, w(_SE1_W, 8, 2)), 0.0)          # (2, 2)
    s = jax.nn.sigmoid(mm(s, w(_SE2_W, 2, 8)))            # (2, 8)
    z = bn(mm(s, w(_F3_W, 8, 8)), _BN_F4, relu=False)     # f[3] conv + f[4] BN

    t = jnp.maximum(left + z, 0.0)                        # residual add + ReLU, (2, 8)

    # head on the batch-flattened 16-vector: one (8,32) matmul instead of two (8,16) ones;
    # the second sample's half is picked with a static lane slice (XLU/VPU, off MXU chain).
    u = mm(t, w(_H1_W, 8, 32))                            # (2, 32)
    h = jnp.maximum(u[0:1, 0:16] + u[1:2, 16:32], 0.0)    # (1, 16)  Linear(16,16)+ReLU
    h = mm(h, w(_H2_W, 16, 8))                            # (1, 8)   Linear(16,8)
    o_ref[0] = mm(h, w(_H3_W, 8, 16))                     # (1, 16)  Linear(8,15), lane 15 = 0


def _run(x2, w_slab, bn_slab):
    """x2: (G, 2, 8) f32 -> (G, 16) f32. One gridded pallas_call over G independent forwards."""
    g = x2.shape[0]
    out = pl.pallas_call(
        functools.partial(_fused_forward_kernel, eps=_EPS),
        out_shape=jax.ShapeDtypeStruct((g, 1, 16), jnp.float32),
        grid=(g,),
        in_specs=[
            pl.BlockSpec((1, 2, 8), lambda i: (i, 0, 0)),
            pl.BlockSpec((_W_ROWS, 128), lambda i: (0, 0)),      # weights resident across grid
            pl.BlockSpec((2, _BN_LANES), lambda i: (0, 0)),
        ],
        out_specs=pl.BlockSpec((1, 1, 16), lambda i: (i, 0, 0)),
        compiler_params=pltpu.CompilerParams(dimension_semantics=("parallel",)),
    )(x2, w_slab, bn_slab)
    return out[:, 0, :]


def model_forward(x, w_slab, bn_slab):
    """Single forward, matching the torch Model: x (2,2,2,2) NCHW -> (15,)."""
    assert x.shape == (2, 2, 2, 2), (
        "fused kernel is specialised to the test geometry "
        "(trunk output must flatten to exactly 16 features for the head)")
    x2 = x.reshape(1, 2, 8)                      # layout-preserving collapse (free)
    return _run(x2, w_slab, bn_slab)[0, :15]


def model_forward_batched(xs, w_slab, bn_slab):
    """Many independent forwards in one pallas_call (amortises launch, uses both TCs on v7x)."""
    g = xs.shape[0]
    assert xs.shape[1:] == (2, 2, 2, 2)
    x2 = xs.reshape(g, 2, 8)
    return _run(x2, w_slab, bn_slab)[:, :15]


# ----------------------------- parameters -----------------------------

def init_params(key):
    ks = jax.random.split(key, 20)

    def w(k, shape, scale=0.3):
        return (scale * jax.random.normal(k, shape)).astype(jnp.float32)

    p = {}
    # trunk.stem: Conv2d(2,4,3,3,s=2,p=1) + BN(4) + ReLU
    p["stem_w"] = w(ks[0], (4, 2, 3, 3))
    p["stem_g"] = 1.0 + 0.1 * jax.random.normal(ks[1], (4,))
    p["stem_b"] = 0.1 * jax.random.normal(ks[2], (4,))
    # ResBlock(4, 8)
    p["proj_w"] = w(ks[3], (8, 4, 1, 1))          # Conv2d(4,8,1x1,s=2)
    p["bn_g"] = 1.0 + 0.1 * jax.random.normal(ks[4], (8,))
    p["bn_b"] = 0.1 * jax.random.normal(ks[5], (8,))
    p["f0_w"] = w(ks[6], (8, 4, 1, 1))            # Conv2d(4,8,1x1)
    p["f0_g"] = 1.0 + 0.1 * jax.random.normal(ks[7], (8,))
    p["f0_b"] = 0.1 * jax.random.normal(ks[8], (8,))
    p["f1_w"] = w(ks[9], (8, 4, 3, 3))            # Conv2d(8,8,3x3,s=2,p=1,groups=2)
    p["f1_g"] = 1.0 + 0.1 * jax.random.normal(ks[10], (8,))
    p["f1_b"] = 0.1 * jax.random.normal(ks[11], (8,))
    p["se1_w"] = w(ks[12], (2, 8, 1, 1))          # Conv2d(8,2,1x1)
    p["se2_w"] = w(ks[13], (8, 2, 1, 1))          # Conv2d(2,8,1x1)
    p["f3_w"] = w(ks[14], (8, 8, 1, 1))           # Conv2d(8,8,1x1)
    p["f4_g"] = 1.0 + 0.1 * jax.random.normal(ks[15], (8,))
    p["f4_b"] = 0.1 * jax.random.normal(ks[16], (8,))
    # head
    p["head1_w"] = w(ks[17], (16, 16))
    p["head2_w"] = w(ks[18], (8, 16))
    p["head3_w"] = w(ks[19], (15, 8))
    return jax.tree.map(lambda a: a.astype(jnp.float32), p)


def pack_params(p):
    """One-time packing: bf16 (80,128) weight slab + f32 (2,64) BN slab."""
    W = jnp.zeros((_W_ROWS, 128), jnp.float32)

    def put(W, row, block):
        block = jnp.asarray(block, jnp.float32)
        return W.at[row:row + block.shape[0], 0:block.shape[1]].set(block)

    W = put(W, _H2_W, p["head2_w"].T)                             # (16, 8)
    # stem 3x3 conv, stride 2, pad 1, on a 2x2 input: output is 1x1 and only the interior
    # 2x2 taps touch real data -> fold to (8,4) matching the NCHW row-major flatten of x.
    W = put(W, _STEM_W, p["stem_w"][:, :, 1:3, 1:3].reshape(4, 8).T)
    # merged [proj | f0] 1x1 convs -> (4, 16)
    W = put(W, _PF_W, jnp.concatenate(
        [p["proj_w"].reshape(8, 4).T, p["f0_w"].reshape(8, 4).T], axis=1))
    # grouped 3x3 conv, stride 2, pad 1, on a 1x1 input: only the centre tap touches data
    # -> fold the two groups into one block-diagonal (8,8) matrix.
    ctr = p["f1_w"][:, :, 1, 1]                                   # (cout=8, cin_per_group=4)
    wbd = jnp.zeros((8, 8), jnp.float32)
    wbd = wbd.at[0:4, 0:4].set(ctr[0:4].T)
    wbd = wbd.at[4:8, 4:8].set(ctr[4:8].T)
    W = put(W, _F1_W, wbd)
    W = put(W, _SE1_W, p["se1_w"].reshape(2, 8).T)
    W = put(W, _SE2_W, p["se2_w"].reshape(8, 2).T)
    W = put(W, _F3_W, p["f3_w"].reshape(8, 8).T)
    h1t = p["head1_w"].T                                          # (16, 16)
    W = put(W, _H1_W, jnp.concatenate([h1t[0:8], h1t[8:16]], axis=1))  # (8, 32)
    W = put(W, _H3_W, p["head3_w"].T)                             # (8,15) -> lane 15 zero
    w_slab = W.astype(jnp.bfloat16)

    B = jnp.zeros((2, _BN_LANES), jnp.float32)
    for off, gname, bname in ((_BN_STEM, "stem_g", "stem_b"),
                              (_BN_PROJ, "bn_g", "bn_b"),
                              (_BN_F0, "f0_g", "f0_b"),
                              (_BN_F1, "f1_g", "f1_b"),
                              (_BN_F4, "f4_g", "f4_b")):
        g, b = p[gname], p[bname]
        B = B.at[0, off:off + g.shape[0]].set(g.astype(jnp.float32))
        B = B.at[1, off:off + b.shape[0]].set(b.astype(jnp.float32))
    return w_slab, B


# ----------------------------- pure-JAX reference (same bf16 operand casts) -----------------------------

def _reference_forward(x, p, eps=_EPS):
    def mm(a, b):
        return jnp.dot(a.astype(jnp.bfloat16), jnp.asarray(b).astype(jnp.bfloat16),
                       preferred_element_type=jnp.float32)

    def bn(y, g, b, relu):
        m = 0.5 * (y[0:1, :] + y[1:2, :])
        d = y - m
        v = 0.5 * (d[0:1, :] * d[0:1, :] + d[1:2, :] * d[1:2, :])
        out = d * (g * jax.lax.rsqrt(v + eps)) + b
        return jnp.maximum(out, 0.0) if relu else out

    x2 = x.reshape(x.shape[0], -1)
    y = bn(mm(x2, p["stem_w"][:, :, 1:3, 1:3].reshape(4, 8).T), p["stem_g"], p["stem_b"], True)
    left = bn(mm(y, p["proj_w"].reshape(8, 4).T), p["bn_g"], p["bn_b"], False)
    z = bn(mm(y, p["f0_w"].reshape(8, 4).T), p["f0_g"], p["f0_b"], True)
    ctr = p["f1_w"][:, :, 1, 1]
    wbd = jnp.zeros((8, 8)).at[0:4, 0:4].set(ctr[0:4].T).at[4:8, 4:8].set(ctr[4:8].T)
    z = bn(mm(z, wbd), p["f1_g"], p["f1_b"], True)
    s = jnp.maximum(mm(z, p["se1_w"].reshape(2, 8).T), 0.0)
    s = jax.nn.sigmoid(mm(s, p["se2_w"].reshape(8, 2).T))
    z = bn(mm(s, p["f3_w"].reshape(8, 8).T), p["f4_g"], p["f4_b"], False)
    t = jnp.maximum(left + z, 0.0)
    v = t.reshape(1, 16)
    h = jnp.maximum(mm(v, p["head1_w"].T), 0.0)
    h = mm(h, p["head2_w"].T)
    return mm(h, p["head3_w"].T)[0]


if __name__ == "__main__":
    key = jax.random.PRNGKey(0)
    kx, kp = jax.random.split(key)
    # Same input shape as the fairscale regnet FSDP test: NCHW (2, 2, 2, 2), which makes
    # the batch-flattened trunk output exactly 16 features for the head.
    x = jax.random.normal(kx, (2, 2, 2, 2), dtype=jnp.float32)
    params = init_params(kp)
    w_slab, bn_slab = pack_params(params)        # one-time weight packing, not per-forward

    fwd = jax.jit(model_forward)
    out = jax.block_until_ready(fwd(x, w_slab, bn_slab))
    assert out.shape == (15,) and out.dtype == jnp.float32
    assert bool(jnp.all(jnp.isfinite(out)))

    ref = _reference_forward(x, params)
    err = float(jnp.max(jnp.abs(out - ref)))
    assert err <= 2e-2 + 2e-2 * float(jnp.max(jnp.abs(ref))), f"kernel/reference mismatch: {err}"

    # amortised multi-forward path: many forwards in one gridded ("parallel") pallas_call
    xs = jax.random.normal(jax.random.PRNGKey(1), (4, 2, 2, 2, 2), dtype=jnp.float32)
    outs = jax.block_until_ready(jax.jit(model_forward_batched)(xs, w_slab, bn_slab))
    assert outs.shape == (4, 15) and bool(jnp.all(jnp.isfinite(outs)))

    print("KERNEL_OK")
</pallas_src>

<mosaic_0001>
module attributes {stable_mosaic.version = 11 : i64} {
  func.func @_fused_forward_kernel(%arg0: i32, %arg1: memref<1x2x8xf32, #tpu.memory_space<vmem>>, %arg2: memref<80x128xbf16, #tpu.memory_space<vmem>>, %arg3: memref<2x64xf32, #tpu.memory_space<vmem>>, %arg4: memref<1x1x16xf32, #tpu.memory_space<vmem>>) attributes {dimension_semantics = [#tpu.dimension_semantics<parallel>], iteration_bounds = array<i64: 1>, scalar_prefetch = 0 : i64, scratch_operands = 0 : i64, tpu.core_type = #tpu.core_type<tc>, window_params = [{transform_indices = @transform_0, window_bounds = array<i64: 1, 2, 8>}, {pipeline_mode = #tpu.pipeline_mode<synchronous>, transform_indices = @transform_1, window_bounds = array<i64: 80, 128>}, {pipeline_mode = #tpu.pipeline_mode<synchronous>, transform_indices = @transform_2, window_bounds = array<i64: 2, 64>}, {transform_indices = @transform_3, window_bounds = array<i64: 1, 1, 16>}]} {
    %c0 = arith.constant 0 : index
    %c0_0 = arith.constant 0 : index
    %c0_1 = arith.constant 0 : index
    %0 = vector.load %arg1[%c0, %c0_0, %c0_1] : memref<1x2x8xf32, #tpu.memory_space<vmem>>, vector<1x2x8xf32>
    %1 = vector.shape_cast %0 : vector<1x2x8xf32> to vector<2x8xf32>
    %c16 = arith.constant 16 : index
    %c0_2 = arith.constant 0 : index
    %2 = vector.load %arg2[%c16, %c0_2] : memref<80x128xbf16, #tpu.memory_space<vmem>>, vector<8x4xbf16>
    %3 = arith.truncf %1 : vector<2x8xf32> to vector<2x8xbf16>
    %cst = arith.constant dense<0.000000e+00> : vector<2x4xf32>
    %4 = tpu.matmul %3, %2, %cst {dimension_numbers = #tpu.dot_dimension_numbers<[1], [0], [0], [1], [0, 0, 1, 1], [], []>} : vector<2x8xbf16>, vector<8x4xbf16>, vector<2x4xf32> -> vector<2x4xf32>
    %c0_3 = arith.constant 0 : index
    %c0_4 = arith.constant 0 : index
    %5 = vector.load %arg3[%c0_3, %c0_4] : memref<2x64xf32, #tpu.memory_space<vmem>>, vector<1x4xf32>
    %c1 = arith.constant 1 : index
    %c0_5 = arith.constant 0 : index
    %6 = vector.load %arg3[%c1, %c0_5] : memref<2x64xf32, #tpu.memory_space<vmem>>, vector<1x4xf32>
    %7 = vector.extract_strided_slice %4 {offsets = [0, 0], sizes = [1, 4], strides = [1, 1]} : vector<2x4xf32> to vector<1x4xf32>
    %8 = vector.extract_strided_slice %4 {offsets = [1, 0], sizes = [1, 4], strides = [1, 1]} : vector<2x4xf32> to vector<1x4xf32>
    %9 = arith.addf %7, %8 : vector<1x4xf32>
    %cst_6 = arith.constant 5.000000e-01 : f32
    %10 = vector.broadcast %cst_6 : f32 to vector<1x4xf32>
    %11 = arith.mulf %10, %9 : vector<1x4xf32>
    %12 = vector.broadcast %11 : vector<1x4xf32> to vector<2x4xf32>
    %13 = arith.subf %4, %12 : vector<2x4xf32>
    %14 = vector.extract_strided_slice %13 {offsets = [0, 0], sizes = [1, 4], strides = [1, 1]} : vector<2x4xf32> to vector<1x4xf32>
    %15 = vector.extract_strided_slice %13 {offsets = [0, 0], sizes = [1, 4], strides = [1, 1]} : vector<2x4xf32> to vector<1x4xf32>
    %16 = arith.mulf %14, %15 : vector<1x4xf32>
    %17 = vector.extract_strided_slice %13 {offsets = [1, 0], sizes = [1, 4], strides = [1, 1]} : vector<2x4xf32> to vector<1x4xf32>
    %18 = vector.extract_strided_slice %13 {offsets = [1, 0], sizes = [1, 4], strides = [1, 1]} : vector<2x4xf32> to vector<1x4xf32>
    %19 = arith.mulf %17, %18 : vector<1x4xf32>
    %20 = arith.addf %16, %19 : vector<1x4xf32>
    %cst_7 = arith.constant 5.000000e-01 : f32
    %21 = vector.broadcast %cst_7 : f32 to vector<1x4xf32>
    %22 = arith.mulf %21, %20 : vector<1x4xf32>
    %cst_8 = arith.constant 9.99999974E-6 : f32
    %23 = vector.broadcast %cst_8 : f32 to vector<1x4xf32>
    %24 = arith.addf %22, %23 : vector<1x4xf32>
    %25 = math.rsqrt %24 : vector<1x4xf32>
    %26 = arith.mulf %5, %25 : vector<1x4xf32>
    %27 = vector.broadcast %26 : vector<1x4xf32> to vector<2x4xf32>
    %28 = arith.mulf %13, %27 : vector<2x4xf32>
    %29 = vector.broadcast %6 : vector<1x4xf32> to vector<2x4xf32>
    %30 = arith.addf %28, %29 : vector<2x4xf32>
    %cst_9 = arith.constant 0.000000e+00 : f32
    %31 = vector.broadcast %cst_9 : f32 to vector<2x4xf32>
    %32 = arith.maximumf %30, %31 : vector<2x4xf32>
    %c24 = arith.constant 24 : index
    %c0_10 = arith.constant 0 : index
    %33 = vector.load %arg2[%c24, %c0_10] : memref<80x128xbf16, #tpu.memory_space<vmem>>, vector<4x16xbf16>
    %34 = arith.truncf %32 : vector<2x4xf32> to vector<2x4xbf16>
    %cst_11 = arith.constant dense<0.000000e+00> : vector<2x16xf32>
    %35 = tpu.matmul %34, %33, %cst_11 {dimension_numbers = #tpu.dot_dimension_numbers<[1], [0], [0], [1], [0, 0, 1, 1], [], []>} : vector<2x4xbf16>, vector<4x16xbf16>, vector<2x16xf32> -> vector<2x16xf32>
    %36 = vector.extract_strided_slice %35 {offsets = [0, 0], sizes = [2, 8], strides = [1, 1]} : vector<2x16xf32> to vector<2x8xf32>
    %c0_12 = arith.constant 0 : index
    %c8 = arith.constant 8 : index
    %37 = vector.load %arg3[%c0_12, %c8] : memref<2x64xf32, #tpu.memory_space<vmem>>, vector<1x8xf32>
    %c1_13 = arith.constant 1 : index
    %c8_14 = arith.constant 8 : index
    %38 = vector.load %arg3[%c1_13, %c8_14] : memref<2x64xf32, #tpu.memory_space<vmem>>, vector<1x8xf32>
    %39 = vector.extract_strided_slice %36 {offsets = [0, 0], sizes = [1, 8], strides = [1, 1]} : vector<2x8xf32> to vector<1x8xf32>
    %40 = vector.extract_strided_slice %36 {offsets = [1, 0], sizes = [1, 8], strides = [1, 1]} : vector<2x8xf32> to vector<1x8xf32>
    %41 = arith.addf %39, %40 : vector<1x8xf32>
    %cst_15 = arith.constant 5.000000e-01 : f32
    %42 = vector.broadcast %cst_15 : f32 to vector<1x8xf32>
    %43 = arith.mulf %42, %41 : vector<1x8xf32>
    %44 = vector.broadcast %43 : vector<1x8xf32> to vector<2x8xf32>
    %45 = arith.subf %36, %44 : vector<2x8xf32>
    %46 = vector.extract_strided_slice %45 {offsets = [0, 0], sizes = [1, 8], strides = [1, 1]} : vector<2x8xf32> to vector<1x8xf32>
    %47 = vector.extract_strided_slice %45 {offsets = [0, 0], sizes = [1, 8], strides = [1, 1]} : vector<2x8xf32> to vector<1x8xf32>
    %48 = arith.mulf %46, %47 : vector<1x8xf32>
    %49 = vector.extract_strided_slice %45 {offsets = [1, 0], sizes = [1, 8], strides = [1, 1]} : vector<2x8xf32> to vector<1x8xf32>
    %50 = vector.extract_strided_slice %45 {offsets = [1, 0], sizes = [1, 8], strides = [1, 1]} : vector<2x8xf32> to vector<1x8xf32>
    %51 = arith.mulf %49, %50 : vector<1x8xf32>
    %52 = arith.addf %48, %51 : vector<1x8xf32>
    %cst_16 = arith.constant 5.000000e-01 : f32
    %53 = vector.broadcast %cst_16 : f32 to vector<1x8xf32>
    %54 = arith.mulf %53, %52 : vector<1x8xf32>
    %cst_17 = arith.constant 9.99999974E-6 : f32
    %55 = vector.broadcast %cst_17 : f32 to vector<1x8xf32>
    %56 = arith.addf %54, %55 : vector<1x8xf32>
    %57 = math.rsqrt %56 : vector<1x8xf32>
    %58 = arith.mulf %37, %57 : vector<1x8xf32>
    %59 = vector.broadcast %58 : vector<1x8xf32> to vector<2x8xf32>
    %60 = arith.mulf %45, %59 : vector<2x8xf32>
    %61 = vector.broadcast %38 : vector<1x8xf32> to vector<2x8xf32>
    %62 = arith.addf %60, %61 : vector<2x8xf32>
    %63 = vector.extract_strided_slice %35 {offsets = [0, 8], sizes = [2, 8], strides = [1, 1]} : vector<2x16xf32> to vector<2x8xf32>
    %c0_18 = arith.constant 0 : index
    %c16_19 = arith.constant 16 : index
    %64 = vector.load %arg3[%c0_18, %c16_19] : memref<2x64xf32, #tpu.memory_space<vmem>>, vector<1x8xf32>
    %c1_20 = arith.constant 1 : index
    %c16_21 = arith.constant 16 : index
    %65 = vector.load %arg3[%c1_20, %c16_21] : memref<2x64xf32, #tpu.memory_space<vmem>>, vector<1x8xf32>
    %66 = vector.extract_strided_slice %63 {offsets = [0, 0], sizes = [1, 8], strides = [1, 1]} : vector<2x8xf32> to vector<1x8xf32>
    %67 = vector.extract_strided_slice %63 {offsets = [1, 0], sizes = [1, 8], strides = [1, 1]} : vector<2x8xf32> to vector<1x8xf32>
    %68 = arith.addf %66, %67 : vector<1x8xf32>
    %cst_22 = arith.constant 5.000000e-01 : f32
    %69 = vector.broadcast %cst_22 : f32 to vector<1x8xf32>
    %70 = arith.mulf %69, %68 : vector<1x8xf32>
    %71 = vector.broadcast %70 : vector<1x8xf32> to vector<2x8xf32>
    %72 = arith.subf %63, %71 : vector<2x8xf32>
    %73 = vector.extract_strided_slice %72 {offsets = [0, 0], sizes = [1, 8], strides = [1, 1]} : vector<2x8xf32> to vector<1x8xf32>
    %74 = vector.extract_strided_slice %72 {offsets = [0, 0], sizes = [1, 8], strides = [1, 1]} : vector<2x8xf32> to vector<1x8xf32>
    %75 = arith.mulf %73, %74 : vector<1x8xf32>
    %76 = vector.extract_strided_slice %72 {offsets = [1, 0], sizes = [1, 8], strides = [1, 1]} : vector<2x8xf32> to vector<1x8xf32>
    %77 = vector.extract_strided_slice %72 {offsets = [1, 0], sizes = [1, 8], strides = [1, 1]} : vector<2x8xf32> to vector<1x8xf32>
    %78 = arith.mulf %76, %77 : vector<1x8xf32>
    %79 = arith.addf %75, %78 : vector<1x8xf32>
    %cst_23 = arith.constant 5.000000e-01 : f32
    %80 = vector.broadcast %cst_23 : f32 to vector<1x8xf32>
    %81 = arith.mulf %80, %79 : vector<1x8xf32>
    %cst_24 = arith.constant 9.99999974E-6 : f32
    %82 = vector.broadcast %cst_24 : f32 to vector<1x8xf32>
    %83 = arith.addf %81, %82 : vector<1x8xf32>
    %84 = math.rsqrt %83 : vector<1x8xf32>
    %85 = arith.mulf %64, %84 : vector<1x8xf32>
    %86 = vector.broadcast %85 : vector<1x8xf32> to vector<2x8xf32>
    %87 = arith.mulf %72, %86 : vector<2x8xf32>
    %88 = vector.broadcast %65 : vector<1x8xf32> to vector<2x8xf32>
    %89 = arith.addf %87, %88 : vector<2x8xf32>
    %cst_25 = arith.constant 0.000000e+00 : f32
    %90 = vector.broadcast %cst_25 : f32 to vector<2x8xf32>
    %91 = arith.maximumf %89, %90 : vector<2x8xf32>
    %c32 = arith.constant 32 : index
    %c0_26 = arith.constant 0 : index
    %92 = vector.load %arg2[%c32, %c0_26] : memref<80x128xbf16, #tpu.memory_space<vmem>>, vector<8x8xbf16>
    %93 = arith.truncf %91 : vector<2x8xf32> to vector<2x8xbf16>
    %cst_27 = arith.constant dense<0.000000e+00> : vector<2x8xf32>
    %94 = tpu.matmul %93, %92, %cst_27 {dimension_numbers = #tpu.dot_dimension_numbers<[1], [0], [0], [1], [0, 0, 1, 1], [], []>} : vector<2x8xbf16>, vector<8x8xbf16>, vector<2x8xf32> -> vector<2x8xf32>
    %c0_28 = arith.constant 0 : index
    %c24_29 = arith.constant 24 : index
    %95 = vector.load %arg3[%c0_28, %c24_29] : memref<2x64xf32, #tpu.memory_space<vmem>>, vector<1x8xf32>
    %c1_30 = arith.constant 1 : index
    %c24_31 = arith.constant 24 : index
    %96 = vector.load %arg3[%c1_30, %c24_31] : memref<2x64xf32, #tpu.memory_space<vmem>>, vector<1x8xf32>
    %97 = vector.extract_strided_slice %94 {offsets = [0, 0], sizes = [1, 8], strides = [1, 1]} : vector<2x8xf32> to vector<1x8xf32>
    %98 = vector.extract_strided_slice %94 {offsets = [1, 0], sizes = [1, 8], strides = [1, 1]} : vector<2x8xf32> to vector<1x8xf32>
    %99 = arith.addf %97, %98 : vector<1x8xf32>
    %cst_32 = arith.constant 5.000000e-01 : f32
    %100 = vector.broadcast %cst_32 : f32 to vector<1x8xf32>
    %101 = arith.mulf %100, %99 : vector<1x8xf32>
    %102 = vector.broadcast %101 : vector<1x8xf32> to vector<2x8xf32>
    %103 = arith.subf %94, %102 : vector<2x8xf32>
    %104 = vector.extract_strided_slice %103 {offsets = [0, 0], sizes = [1, 8], strides = [1, 1]} : vector<2x8xf32> to vector<1x8xf32>
    %105 = vector.extract_strided_slice %103 {offsets = [0, 0], sizes = [1, 8], strides = [1, 1]} : vector<2x8xf32> to vector<1x8xf32>
    %106 = arith.mulf %104, %105 : vector<1x8xf32>
    %107 = vector.extract_strided_slice %103 {offsets = [1, 0], sizes = [1, 8], strides = [1, 1]} : vector<2x8xf32> to vector<1x8xf32>
    %108 = vector.extract_strided_slice %103 {offsets = [1, 0], sizes = [1, 8], strides = [1, 1]} : vector<2x8xf32> to vector<1x8xf32>
    %109 = arith.mulf %107, %108 : vector<1x8xf32>
    %110 = arith.addf %106, %109 : vector<1x8xf32>
    %cst_33 = arith.constant 5.000000e-01 : f32
    %111 = vector.broadcast %cst_33 : f32 to vector<1x8xf32>
    %112 = arith.mulf %111, %110 : vector<1x8xf32>
    %cst_34 = arith.constant 9.99999974E-6 : f32
    %113 = vector.broadcast %cst_34 : f32 to vector<1x8xf32>
    %114 = arith.addf %112, %113 : vector<1x8xf32>
    %115 = math.rsqrt %114 : vector<1x8xf32>
    %116 = arith.mulf %95, %115 : vector<1x8xf32>
    %117 = vector.broadcast %116 : vector<1x8xf32> to vector<2x8xf32>
    %118 = arith.mulf %103, %117 : vector<2x8xf32>
    %119 = vector.broadcast %96 : vector<1x8xf32> to vector<2x8xf32>
    %120 = arith.addf %118, %119 : vector<2x8xf32>
    %cst_35 = arith.constant 0.000000e+00 : f32
    %121 = vector.broadcast %cst_35 : f32 to vector<2x8xf32>
    %122 = arith.maximumf %120, %121 : vector<2x8xf32>
    %c40 = arith.constant 40 : index
    %c0_36 = arith.constant 0 : index
    %123 = vector.load %arg2[%c40, %c0_36] : memref<80x128xbf16, #tpu.memory_space<vmem>>, vector<8x2xbf16>
    %124 = arith.truncf %122 : vector<2x8xf32> to vector<2x8xbf16>
    %cst_37 = arith.constant dense<0.000000e+00> : vector<2x2xf32>
    %125 = tpu.matmul %124, %123, %cst_37 {dimension_numbers = #tpu.dot_dimension_numbers<[1], [0], [0], [1], [0, 0, 1, 1], [], []>} : vector<2x8xbf16>, vector<8x2xbf16>, vector<2x2xf32> -> vector<2x2xf32>
    %cst_38 = arith.constant 0.000000e+00 : f32
    %126 = vector.broadcast %cst_38 : f32 to vector<2x2xf32>
    %127 = arith.maximumf %125, %126 : vector<2x2xf32>
    %c48 = arith.constant 48 : index
    %c0_39 = arith.constant 0 : index
    %128 = vector.load %arg2[%c48, %c0_39] : memref<80x128xbf16, #tpu.memory_space<vmem>>, vector<2x8xbf16>
    %129 = arith.truncf %127 : vector<2x2xf32> to vector<2x2xbf16>
    %cst_40 = arith.constant dense<0.000000e+00> : vector<2x8xf32>
    %130 = tpu.matmul %129, %128, %cst_40 {dimension_numbers = #tpu.dot_dimension_numbers<[1], [0], [0], [1], [0, 0, 1, 1], [], []>} : vector<2x2xbf16>, vector<2x8xbf16>, vector<2x8xf32> -> vector<2x8xf32>
    %131 = arith.negf %130 : vector<2x8xf32>
    %132 = math.exp %131 : vector<2x8xf32>
    %cst_41 = arith.constant 1.000000e+00 : f32
    %133 = vector.broadcast %cst_41 : f32 to vector<2x8xf32>
    %134 = arith.addf %133, %132 : vector<2x8xf32>
    %135 = arith.divf %133, %134 : vector<2x8xf32>
    %c56 = arith.constant 56 : index
    %c0_42 = arith.constant 0 : index
    %136 = vector.load %arg2[%c56, %c0_42] : memref<80x128xbf16, #tpu.memory_space<vmem>>, vector<8x8xbf16>
    %137 = arith.truncf %135 : vector<2x8xf32> to vector<2x8xbf16>
    %cst_43 = arith.constant dense<0.000000e+00> : vector<2x8xf32>
    %138 = tpu.matmul %137, %136, %cst_43 {dimension_numbers = #tpu.dot_dimension_numbers<[1], [0], [0], [1], [0, 0, 1, 1], [], []>} : vector<2x8xbf16>, vector<8x8xbf16>, vector<2x8xf32> -> vector<2x8xf32>
    %c0_44 = arith.constant 0 : index
    %c32_45 = arith.constant 32 : index
    %139 = vector.load %arg3[%c0_44, %c32_45] : memref<2x64xf32, #tpu.memory_space<vmem>>, vector<1x8xf32>
    %c1_46 = arith.constant 1 : index
    %c32_47 = arith.constant 32 : index
    %140 = vector.load %arg3[%c1_46, %c32_47] : memref<2x64xf32, #tpu.memory_space<vmem>>, vector<1x8xf32>
    %141 = vector.extract_strided_slice %138 {offsets = [0, 0], sizes = [1, 8], strides = [1, 1]} : vector<2x8xf32> to vector<1x8xf32>
    %142 = vector.extract_strided_slice %138 {offsets = [1, 0], sizes = [1, 8], strides = [1, 1]} : vector<2x8xf32> to vector<1x8xf32>
    %143 = arith.addf %141, %142 : vector<1x8xf32>
    %cst_48 = arith.constant 5.000000e-01 : f32
    %144 = vector.broadcast %cst_48 : f32 to vector<1x8xf32>
    %145 = arith.mulf %144, %143 : vector<1x8xf32>
    %146 = vector.broadcast %145 : vector<1x8xf32> to vector<2x8xf32>
    %147 = arith.subf %138, %146 : vector<2x8xf32>
    %148 = vector.extract_strided_slice %147 {offsets = [0, 0], sizes = [1, 8], strides = [1, 1]} : vector<2x8xf32> to vector<1x8xf32>
    %149 = vector.extract_strided_slice %147 {offsets = [0, 0], sizes = [1, 8], strides = [1, 1]} : vector<2x8xf32> to vector<1x8xf32>
    %150 = arith.mulf %148, %149 : vector<1x8xf32>
    %151 = vector.extract_strided_slice %147 {offsets = [1, 0], sizes = [1, 8], strides = [1, 1]} : vector<2x8xf32> to vector<1x8xf32>
    %152 = vector.extract_strided_slice %147 {offsets = [1, 0], sizes = [1, 8], strides = [1, 1]} : vector<2x8xf32> to vector<1x8xf32>
    %153 = arith.mulf %151, %152 : vector<1x8xf32>
    %154 = arith.addf %150, %153 : vector<1x8xf32>
    %cst_49 = arith.constant 5.000000e-01 : f32
    %155 = vector.broadcast %cst_49 : f32 to vector<1x8xf32>
    %156 = arith.mulf %155, %154 : vector<1x8xf32>
    %cst_50 = arith.constant 9.99999974E-6 : f32
    %157 = vector.broadcast %cst_50 : f32 to vector<1x8xf32>
    %158 = arith.addf %156, %157 : vector<1x8xf32>
    %159 = math.rsqrt %158 : vector<1x8xf32>
    %160 = arith.mulf %139, %159 : vector<1x8xf32>
    %161 = vector.broadcast %160 : vector<1x8xf32> to vector<2x8xf32>
    %162 = arith.mulf %147, %161 : vector<2x8xf32>
    %163 = vector.broadcast %140 : vector<1x8xf32> to vector<2x8xf32>
    %164 = arith.addf %162, %163 : vector<2x8xf32>
    %165 = arith.addf %62, %164 : vector<2x8xf32>
    %cst_51 = arith.constant 0.000000e+00 : f32
    %166 = vector.broadcast %cst_51 : f32 to vector<2x8xf32>
    %167 = arith.maximumf %165, %166 : vector<2x8xf32>
    %c64 = arith.constant 64 : index
    %c0_52 = arith.constant 0 : index
    %168 = vector.load %arg2[%c64, %c0_52] : memref<80x128xbf16, #tpu.memory_space<vmem>>, vector<8x32xbf16>
    %169 = arith.truncf %167 : vector<2x8xf32> to vector<2x8xbf16>
    %cst_53 = arith.constant dense<0.000000e+00> : vector<2x32xf32>
    %170 = tpu.matmul %169, %168, %cst_53 {dimension_numbers = #tpu.dot_dimension_numbers<[1], [0], [0], [1], [0, 0, 1, 1], [], []>} : vector<2x8xbf16>, vector<8x32xbf16>, vector<2x32xf32> -> vector<2x32xf32>
    %171 = vector.extract_strided_slice %170 {offsets = [0, 0], sizes = [1, 16], strides = [1, 1]} : vector<2x32xf32> to vector<1x16xf32>
    %172 = vector.extract_strided_slice %170 {offsets = [1, 16], sizes = [1, 16], strides = [1, 1]} : vector<2x32xf32> to vector<1x16xf32>
    %173 = arith.addf %171, %172 : vector<1x16xf32>
    %cst_54 = arith.constant 0.000000e+00 : f32
    %174 = vector.broadcast %cst_54 : f32 to vector<1x16xf32>
    %175 = arith.maximumf %173, %174 : vector<1x16xf32>
    %c0_55 = arith.constant 0 : index
    %c0_56 = arith.constant 0 : index
    %176 = vector.load %arg2[%c0_55, %c0_56] : memref<80x128xbf16, #tpu.memory_space<vmem>>, vector<16x8xbf16>
    %177 = arith.truncf %175 : vector<1x16xf32> to vector<1x16xbf16>
    %cst_57 = arith.constant dense<0.000000e+00> : vector<1x8xf32>
    %178 = tpu.matmul %177, %176, %cst_57 {dimension_numbers = #tpu.dot_dimension_numbers<[1], [0], [0], [1], [0, 0, 1, 1], [], []>} : vector<1x16xbf16>, vector<16x8xbf16>, vector<1x8xf32> -> vector<1x8xf32>
    %c72 = arith.constant 72 : index
    %c0_58 = arith.constant 0 : index
    %179 = vector.load %arg2[%c72, %c0_58] : memref<80x128xbf16, #tpu.memory_space<vmem>>, vector<8x16xbf16>
    %180 = arith.truncf %178 : vector<1x8xf32> to vector<1x8xbf16>
    %cst_59 = arith.constant dense<0.000000e+00> : vector<1x16xf32>
    %181 = tpu.matmul %180, %179, %cst_59 {dimension_numbers = #tpu.dot_dimension_numbers<[1], [0], [0], [1], [0, 0, 1, 1], [], []>} : vector<1x8xbf16>, vector<8x16xbf16>, vector<1x16xf32> -> vector<1x16xf32>
    %c0_60 = arith.constant 0 : index
    %c0_61 = arith.constant 0 : index
    %c0_62 = arith.constant 0 : index
    %182 = vector.load %arg4[%c0_60, %c0_61, %c0_62] : memref<1x1x16xf32, #tpu.memory_space<vmem>>, vector<1x1x16xf32>
    %183 = vector.shape_cast %182 : vector<1x1x16xf32> to vector<1x16xf32>
    %184 = vector.shape_cast %181 : vector<1x16xf32> to vector<1x1x16xf32>
    tpu.vector_store %arg4[%c0_60, %c0_61, %c0_62], %184 {strides = array<i32>} : memref<1x1x16xf32, #tpu.memory_space<vmem>>, vector<1x1x16xf32>,
    return
  }
  func.func @transform_0(%arg0: i32) -> (i32, i32, i32) {
    %c0_i32 = arith.constant 0 : i32
    %c0_i32_0 = arith.constant 0 : i32
    %c0_i32_1 = arith.constant 0 : i32
    return %arg0, %c0_i32, %c0_i32_0 : i32, i32, i32
  }
  func.func @transform_1(%arg0: i32) -> (i32, i32) {
    %c0_i32 = arith.constant 0 : i32
    %c0_i32_0 = arith.constant 0 : i32
    %c0_i32_1 = arith.constant 0 : i32
    return %c0_i32, %c0_i32_0 : i32, i32
  }
  func.func @transform_2(%arg0: i32) -> (i32, i32) {
    %c0_i32 = arith.constant 0 : i32
    %c0_i32_0 = arith.constant 0 : i32
    %c0_i32_1 = arith.constant 0 : i32
    return %c0_i32, %c0_i32_0 : i32, i32
  }
  func.func @transform_3(%arg0: i32) -> (i32, i32, i32) {
    %c0_i32 = arith.constant 0 : i32
    %c0_i32_0 = arith.constant 0 : i32
    %c0_i32_1 = arith.constant 0 : i32
    return %arg0, %c0_i32, %c0_i32_0 : i32, i32, i32
  }
}

</mosaic_0001>

<bundles_post_ra>
// kernel: model_forward.1
= control target key start
LH: loop header
LB: loop body
LE: loop exit
PB: predicated region body
PF: predicated region fallthrough
CT: control target
= control target key end

     0   :  { %8 = vsyncpa [#allocation3], 0  ;;  %s775_s12 = smov [#allocation2]   ;;  %s896_s0 = inlined_call_operand.vmem [shape: f32[1,2,8], index: 0, kind: input, shape index: {}]   ;;  %s897_s1 = inlined_call_operand.hbm [shape: bf16[80,128], index: 1, kind: input, shape index: {}]   ;;  %s898_s2 = inlined_call_operand.vmem [shape: f32[2,64], index: 2, kind: input, shape index: {}]   ;;  %s899_s3 = inlined_call_operand.vmem [shape: f32[1,1,16], index: 3, kind: output, shape index: {}]  }
   0x1   :  { %s16_s13 = sshll.u32 %s775_s12, 4  ;;  %s751_s16 = scalar_lea.hbm %s897_s1, 640  ;;  %s17_s13 = int_to_ptr.vmem [resolvable:$true] %s16_s13 }
   0x2   :  { %p752_p0 = scmp.ne.s32.totalorder %s897_s1, %s751_s16  ;;  %p755_p1 = scmp.lt.u32.totalorder %s751_s16, %s897_s1 }
   0x4   :  { %p757_p2 = pnand %p755_p1, %p752_p0 }
   0x6   :  { %760 = shalt.err (!%p757_p2)
}
   0x7   :  { %s761_s21 = scalar_lea.vmem %s17_s13, 640  ;;  %p766_p4 = scmp.lt.s32.totalorder %s17_s13, %s17_s13 }
   0x8   :  { %p762_p3 = scmp.ne.s32.totalorder %s17_s13, %s761_s21  ;;  %p767_p5 = scmp.lt.s32.totalorder %s761_s21, %s761_s21 }
   0xa   :  { %p768_p6 = por %p767_p5, %p766_p4 }
   0xc   :  { %p769_p7 = pnand %p768_p6, %p762_p3 }
   0xe   :  { %772 = shalt.err (!%p769_p7)
}
   0xf   :  { %s776_s22 = smov 64   ;;  %s777_s23 = smov 4  }
  0x10   :  { %22 = dma.hbm_to_vmem [thread:$0]  %s897_s1, 640, %s17_s13, [#allocation3], %s776_s22, %s776_s22, %s777_s23  }
  0x11   :  { %773 = dma.done.wait [#allocation3], 640  }
  0x12   :  { %774 = vsyncadd [#allocation3], 4294966656  ;;  %v778_v0 = vmov 0.0   ;;  %vm779_vm0 = vmmov 0   ;;  %vm36_vm1 = vcmask 1043456   ;;  %vm32_vm2 = vcmask 64512  }
  0x13   :  { %672 = vmatprep.subr.bf16.mxu0 %v778_v0  ;;  %674 = vmatprep.mubr.msk.bf16.mxu0 %vm779_vm0, %v778_v0  ;;  %v30_v1 = vld [vmem:[#allocation2 + $0x8] sm:$0xf]  ;;  %v29_v2 = vld [vmem:[%s896_s0] sm:$0x3]  ;;  %v112_v5 = vld [vmem:[#allocation2 + $0xc] sm:$0x3]  ;;  %v87_v7 = vlaneseq }
  0x14   :  { %678 = vmatprep.subr.bf16.mxu1 %v778_v0  ;;  %680 = vmatprep.mubr.msk.bf16.mxu1 %vm779_vm0, %v778_v0  ;;  %v38_v3 = vsel %vm36_vm1, %v30_v1, 0  ;;  %v31_v4 = vpack.c.bf16 %v29_v2, %v29_v2  ;;  %vm118_vm3 = vcmask 1041408   ;;  %v840_v24 = vld [vmem:[%s898_s2] sm:$0x1]  ;;  %v847_v28 = vld [vmem:[%s898_s2 + $0x1] ss:$0 sm:$0xff] }
  0x15   :  { %673 = vmatpush3.bf16.msra.mxu0 %v38_v3  ;;  %v120_v6 = vsel %vm118_vm3, %v112_v5, 0  ;;  %v88_v8 = vshrl.u32 %v87_v7, 7  ;;  %vm114_vm4 = vcmask 31744   ;;  %s780_s2 = smov 120   ;;  %s781_s30 = smov 8   ;;  %vm343_vm5 = vcmask 1040384  }
  0x16   :  { %684 = vmatprep.subr.bf16.mxu0 %v778_v0  ;;  %679 = vmatpush3.bf16.msra.mxu1 %v120_v6  ;;  %v200_v49 = vld [vmem:[#allocation2 + $0x10] sm:$0xf]  ;;  %s782_s4 = smov 24   ;;  %s783_s5 = smov 104   ;;  %vm339_vm6 = vcmask 15360   ;;  %vm543_vm7 = vcmask 130048  }
  0x17   :  { %690 = vmatprep.subr.bf16.mxu1 %v778_v0  ;;  %v834_v14 = vsub.s32 0, %v88_v8  ;;  %195 = vrot.lane.b32.xlu1 %v847_v28, %s780_s2  ;;  %v209_v51 = vsel %vm36_vm1, %v200_v49, 0  ;;  %s784_s6 = smov 32   ;;  %s785_s7 = smov 96   ;;  %vm635_vm8 = vcmask 122880  }
  0x18   :  { %675 = vmatmul.mubr.msk.bf16.vlgmr.msra.gmra.mrb[0].mxu0 %vm32_vm2, %v31_v4  ;;  %s786_s8 = smov 112  }
  0x19   :  { %686 = vmatprep.mubr.msk.bf16.mxu0 %vm779_vm0, %v778_v0  ;;  %685 = vmatpush3.bf16.msra.mxu0 %v209_v51 }
  0x1a   :  { %696 = vmatprep.subr.bf16.mxu0 %v778_v0 }
  0x89   :  { %v196_v54 = vpop.permute.xlu1 %195 }
  0xeb   :  { %v74_v9 = vpop.f32.mrb[0].mxu0 }
  0xec   :  { %v83_v10 = vrot.slane %v74_v9, 1  ;;  %v676_v11 = vpop.f32.mrb[1].mxu0 }
  0xed   :  { %v77_v12 = vpop.f32.mrb[2].mxu0 }
  0xee   :  { %v85_v13 = vadd.f32 %v83_v10, %v74_v9  ;;  %v677_v15 = vpop.f32.mrb[3].mxu0  ;;  %v288_v12 = vld [vmem:[#allocation2 + $0x14] sm:$0xf] }
  0xf0   :  { %v86_v16 = vmul.f32 0.5, %v85_v13  ;;  %v294_v13 = vsel %vm36_vm1, %v288_v12, 0 }
  0xf2   :  { %v90_v17 = vrot.slane %v86_v16, %v834_v14  ;;  %v337_v16 = vld [vmem:[#allocation2 + $0x18] sm:$0x1] }
  0xf4   :  { %v91_v18 = vsub.f32 %v74_v9, %v90_v17 }
  0xf6   :  { %v92_v19 = vmul.f32 %v91_v18, %v91_v18 }
  0xf8   :  { %v94_v20 = vrot.slane %v92_v19, 1 }
  0xfa   :  { %v96_v21 = vadd.f32 %v94_v20, %v92_v19 }
  0xfc   :  { %v97_v22 = vmul.f32 0.5, %v96_v21 }
  0xfe   :  { %v98_v23 = vadd.f32 1e-05, %v97_v22 }
 0x100   :  { %739 = vrsqrt.f32 %v98_v23 }
 0x10a   :  { %v740_v25 = vpop.eup %739 }
 0x10b   :  { %v100_v26 = vmul.f32 %v740_v25, %v840_v24 }
 0x10d   :  { %v104_v27 = vrot.slane %v100_v26, %v834_v14 }
 0x10f   :  { %v105_v29 = vmul.f32 %v104_v27, %v91_v18  ;;  %v345_v18 = vsel %vm343_vm5, %v337_v16, 0 }
 0x111   :  { %v110_v30 = vadd.f32 %v847_v28, %v105_v29 }
 0x113   :  { %v111_v31 = vmax.f32 %v110_v30, 0.0 }
 0x115   :  { %v113_v32 = vpack.c.bf16 %v111_v31, %v111_v31 }
 0x117   :  { %681 = vmatmul.mubr.msk.bf16.vlgmr.msra.gmra.mrb[0].mxu1 %vm114_vm4, %v113_v32 }
 0x118   :  { %692 = vmatprep.mubr.msk.bf16.mxu1 %vm779_vm0, %v778_v0  ;;  %691 = vmatpush3.bf16.msra.mxu1 %v294_v13 }
 0x119   :  { %702 = vmatprep.subr.bf16.mxu1 %v778_v0 }
 0x1ea   :  { %v156_v33 = vpop.f32.mrb[0].mxu1 }
 0x1eb   :  { %v163_v34 = vrot.slane %v156_v33, 1  ;;  %v682_v35 = vpop.f32.mrb[1].mxu1 }
 0x1ec   :  { %v159_v36 = vpop.f32.mrb[2].mxu1 }
 0x1ed   :  { %v165_v37 = vadd.f32 %v163_v34, %v156_v33  ;;  %v683_v38 = vpop.f32.mrb[3].mxu1  ;;  %v393_v34 = vld [vmem:[#allocation2 + $0x1c] sm:$0xf] }
 0x1ee   :  { %v399_v35 = vsel %vm36_vm1, %v393_v34, 0 }
 0x1ef   :  { %v166_v39 = vmul.f32 0.5, %v165_v37 }
 0x1f1   :  { %v170_v40 = vrot.slane %v166_v39, %v834_v14 }
 0x1f3   :  { %v171_v41 = vsub.f32 %v156_v33, %v170_v40 }
 0x1f5   :  { %v172_v42 = vmul.f32 %v171_v41, %v171_v41 }
 0x1f7   :  { %v174_v43 = vrot.slane %v172_v42, 1 }
 0x1f9   :  { %v176_v44 = vadd.f32 %v174_v43, %v172_v42 }
 0x1fb   :  { %v177_v45 = vmul.f32 0.5, %v176_v44 }
 0x1fd   :  { %v178_v46 = vadd.f32 1e-05, %v177_v45 }
 0x1ff   :  { %741 = vrsqrt.f32 %v178_v46 }
 0x209   :  { %v742_v47 = vpop.eup %741 }
 0x20a   :  { %181 = vrot.lane.b32.xlu0 %v742_v47, %s781_s30 }
 0x27c   :  { %v182_v48 = vpop.permute.xlu0 %181 }
 0x27d   :  { %v184_v50 = vmul.f32 %v182_v48, %v840_v24 }
 0x27f   :  { %v188_v52 = vrot.slane %v184_v50, %v834_v14 }
 0x281   :  { %190 = vrot.lane.b32.xlu0 %v188_v52, %s780_s2 }
 0x2f3   :  { %v191_v53 = vpop.permute.xlu0 %190 }
 0x2f4   :  { %v193_v55 = vmul.f32 %v191_v53, %v171_v41 }
 0x2f6   :  { %v858_v56 = vadd.f32 %v196_v54, %v193_v55 }
 0x2f8   :  { %v199_v57 = vmax.f32 %v858_v56, 0.0 }
 0x2fa   :  { %v201_v58 = vpack.c.bf16 %v199_v57, %v199_v57 }
 0x2fc   :  { %203 = vrot.lane.b32.xlu1 %v201_v58, %s780_s2 }
 0x36e   :  { %v204_v59 = vpop.permute.xlu1 %203 }
 0x36f   :  { %687 = vmatmul.mubr.msk.bf16.vlgmr.msra.gmra.mrb[4].mxu0 %vm32_vm2, %v204_v59 }
 0x370   :  { %698 = vmatprep.mubr.msk.bf16.mxu0 %vm779_vm0, %v778_v0  ;;  %697 = vmatpush3.bf16.msra.mxu0 %v345_v18 }
 0x371   :  { %708 = vmatprep.subr.bf16.mxu0 %v778_v0 }
 0x442   :  { %v245_v60 = vpop.f32.mrb[4].mxu0 }
 0x443   :  { %v252_v61 = vrot.slane %v245_v60, 1  ;;  %v688_v62 = vpop.f32.mrb[5].mxu0 }
 0x444   :  { %v248_v63 = vpop.f32.mrb[6].mxu0 }
 0x445   :  { %v254_v1 = vadd.f32 %v252_v61, %v245_v60  ;;  %v689_v2 = vpop.f32.mrb[7].mxu0  ;;  %v479_v61 = vld [vmem:[#allocation2 + $0x20] sm:$0xf] }
 0x446   :  { %v485_v62 = vsel %vm36_vm1, %v479_v61, 0 }
 0x447   :  { %v255_v3 = vmul.f32 0.5, %v254_v1 }
 0x449   :  { %v259_v4 = vrot.slane %v255_v3, %v834_v14 }
 0x44b   :  { %v260_v5 = vsub.f32 %v245_v60, %v259_v4 }
 0x44d   :  { %v261_v6 = vmul.f32 %v260_v5, %v260_v5 }
 0x44f   :  { %v263_v7 = vrot.slane %v261_v6, 1 }
 0x451   :  { %v265_v8 = vadd.f32 %v263_v7, %v261_v6 }
 0x453   :  { %v266_v9 = vmul.f32 0.5, %v265_v8 }
 0x455   :  { %v267_v10 = vadd.f32 1e-05, %v266_v9  ;;  %v738_v9 = vld [vmem:[#allocation2] sm:$0xff]  }
 0x457   :  { %743 = vrsqrt.f32 %v267_v10  ;;  %v587_v10 = vld [vmem:[#allocation2 + $0x24] sm:$0xf] }
 0x461   :  { %v744_v11 = vpop.eup %743 }
 0x462   :  { %270 = vrot.lane.b32.xlu0 %v744_v11, %s782_s4 }
 0x466   :  { %283 = vrot.lane.b32.xlu0 %v847_v28, %s783_s5 }
 0x4d4   :  { %v271_v15 = vpop.permute.xlu0 %270 }
 0x4d5   :  { %v273_v17 = vmul.f32 %v271_v15, %v840_v24 }
 0x4d7   :  { %v277_v19 = vrot.slane %v273_v17, %v834_v14 }
 0x4d8   :  { %v284_v21 = vpop.permute.xlu0 %283 }
 0x4d9   :  { %279 = vrot.lane.b32.xlu1 %v277_v19, %s783_s5 }
 0x54b   :  { %v280_v20 = vpop.permute.xlu1 %279 }
 0x54c   :  { %v282_v22 = vmul.f32 %v280_v20, %v260_v5 }
 0x54e   :  { %v286_v23 = vadd.f32 %v284_v21, %v282_v22 }
 0x550   :  { %v287_v25 = vmax.f32 %v286_v23, 0.0 }
 0x552   :  { %v289_v26 = vpack.c.bf16 %v287_v25, %v287_v25 }
 0x554   :  { %693 = vmatmul.mubr.msk.bf16.vlgmr.msra.gmra.mrb[4].mxu1 %vm32_vm2, %v289_v26 }
 0x555   :  { %704 = vmatprep.mubr.msk.bf16.mxu1 %vm779_vm0, %v778_v0  ;;  %703 = vmatpush3.bf16.msra.mxu1 %v399_v35 }
 0x556   :  { %714 = vmatprep.subr.bf16.mxu1 %v778_v0 }
 0x627   :  { %v330_v27 = vpop.f32.mrb[4].mxu1 }
 0x628   :  { %v336_v29 = vmax.f32 %v330_v27, 0.0  ;;  %v694_v30 = vpop.f32.mrb[5].mxu1 }
 0x629   :  { %v333_v31 = vpop.f32.mrb[6].mxu1 }
 0x62a   :  { %v338_v32 = vpack.c.bf16 %v336_v29, %v336_v29  ;;  %v695_v33 = vpop.f32.mrb[7].mxu1 }
 0x62c   :  { %699 = vmatmul.mubr.msk.bf16.vlgmr.msra.gmra.mrb[8].mxu0 %vm339_vm6, %v338_v32 }
 0x62d   :  { %710 = vmatprep.mubr.msk.bf16.mxu0 %vm779_vm0, %v778_v0  ;;  %709 = vmatpush3.bf16.msra.mxu0 %v485_v62 }
 0x62e   :  { %720 = vmatprep.subr.bf16.mxu0 %v778_v0 }
 0x6ff   :  { %v381_v36 = vpop.f32.mrb[8].mxu0 }
 0x700   :  { %v648_v37 = vmul.f32 -1.442695, %v381_v36  ;;  %v700_v38 = vpop.f32.mrb[9].mxu0 }
 0x701   :  { %v384_v39 = vpop.f32.mrb[10].mxu0 }
 0x702   :  { %745 = vpow2.f32 %v648_v37  ;;  %v701_v40 = vpop.f32.mrb[11].mxu0 }
 0x70c   :  { %v746_v41 = vpop.eup %745 }
 0x70d   :  { %v390_v42 = vadd.f32 1.0, %v746_v41 }
 0x70f   :  { %747 = vrcp.f32 %v390_v42 }
 0x719   :  { %v748_v43 = vpop.eup %747 }
 0x71a   :  { %v394_v44 = vpack.c.bf16 %v748_v43, %v748_v43 }
 0x71c   :  { %705 = vmatmul.mubr.msk.bf16.vlgmr.msra.gmra.mrb[8].mxu1 %vm32_vm2, %v394_v44 }
 0x71d   :  { %716 = vmatprep.mubr.msk.bf16.mxu1 %vm779_vm0, %v778_v0  ;;  %715 = vmatpush3.bf16.msra.mxu1 %v738_v9 }
 0x7ef   :  { %v435_v45 = vpop.f32.mrb[8].mxu1 }
 0x7f0   :  { %v442_v46 = vrot.slane %v435_v45, 1  ;;  %v706_v47 = vpop.f32.mrb[9].mxu1 }
 0x7f1   :  { %v438_v48 = vpop.f32.mrb[10].mxu1 }
 0x7f2   :  { %v444_v49 = vadd.f32 %v442_v46, %v435_v45  ;;  %v707_v50 = vpop.f32.mrb[11].mxu1 }
 0x7f4   :  { %v445_v51 = vmul.f32 0.5, %v444_v49 }
 0x7f6   :  { %v449_v52 = vrot.slane %v445_v51, %v834_v14 }
 0x7f8   :  { %v450_v53 = vsub.f32 %v435_v45, %v449_v52 }
 0x7fa   :  { %v451_v54 = vmul.f32 %v450_v53, %v450_v53 }
 0x7fc   :  { %v453_v55 = vrot.slane %v451_v54, 1 }
 0x7fe   :  { %v455_v57 = vadd.f32 %v453_v55, %v451_v54 }
 0x800   :  { %v456_v58 = vmul.f32 0.5, %v455_v57 }
 0x802   :  { %v457_v59 = vadd.f32 1e-05, %v456_v58 }
 0x804   :  { %749 = vrsqrt.f32 %v457_v59 }
 0x80e   :  { %v750_v60 = vpop.eup %749 }
 0x80f   :  { %460 = vrot.lane.b32.xlu1 %v750_v60, %s784_s6 }
 0x813   :  { %473 = vrot.lane.b32.xlu1 %v847_v28, %s785_s7 }
 0x881   :  { %v461_v63 = vpop.permute.xlu1 %460 }
 0x882   :  { %v463_v1 = vmul.f32 %v461_v63, %v840_v24  ;;  %v593_v24 = vsel %vm36_vm1, %v587_v10, 0 }
 0x884   :  { %v467_v2 = vrot.slane %v463_v1, %v834_v14 }
 0x885   :  { %v474_v4 = vpop.permute.xlu1 %473 }
 0x886   :  { %469 = vrot.lane.b32.xlu0 %v467_v2, %s785_s7 }
 0x8f8   :  { %v470_v3 = vpop.permute.xlu0 %469 }
 0x8f9   :  { %v472_v5 = vmul.f32 %v470_v3, %v450_v53 }
 0x8fb   :  { %v476_v6 = vadd.f32 %v474_v4, %v472_v5 }
 0x8fd   :  { %v477_v7 = vadd.f32 %v476_v6, %v858_v56 }
 0x8ff   :  { %v478_v8 = vmax.f32 %v477_v7, 0.0 }
 0x901   :  { %v480_v28 = vpack.c.bf16 %v478_v8, %v478_v8 }
 0x903   :  { %711 = vmatmul.mubr.msk.bf16.vlgmr.msra.gmra.mrb[12].mxu0 %vm32_vm2, %v480_v28 }
 0x904   :  { %722 = vmatprep.mubr.msk.bf16.mxu0 %vm779_vm0, %v778_v0  ;;  %721 = vmatpush3.bf16.msra.mxu0 %v593_v24 }
 0x9d6   :  { %v521_v14 = vpop.f32.mrb[12].mxu0 }
 0x9d7   :  { %v528_v11 = vrot.slane %v521_v14, 1  ;;  %v712_v12 = vpop.f32.mrb[13].mxu0 }
 0x9d8   :  { %v524_v13 = vpop.f32.mrb[14].mxu0 }
 0x9d9   :  { %529 = vrot.lane.b32.xlu0 %v528_v11, %s786_s8  ;;  %v713_v56 = vpop.f32.mrb[15].mxu0 }
 0xa4b   :  { %v530_v15 = vpop.permute.xlu0 %529 }
 0xa4c   :  { %v532_v16 = vadd.f32 %v530_v15, %v521_v14 }
 0xa4e   :  { %v533_v17 = vmax.f32 %v532_v16, 0.0 }
 0xa50   :  { %v536_v18 = vpack.c.bf16 %v533_v17, %v533_v17 }
 0xa52   :  { %717 = vmatmul.mubr.msk.bf16.vlgmr.msra.gmra.mrb[12].mxu1 %vm543_vm7, %v536_v18 }
 0xb25   :  { %v581_v0 = vpop.f32.mrb[12].mxu1 }
 0xb26   :  { %v588_v19 = vpack.c.bf16 %v581_v0, %v581_v0  ;;  %v718_v20 = vpop.f32.mrb[13].mxu1 }
 0xb27   :  { %v584_v21 = vpop.f32.mrb[14].mxu1 }
 0xb28   :  { %v719_v22 = vpop.f32.mrb[15].mxu1  ;;  %723 = vmatmul.mubr.msk.bf16.vlgmr.msra.gmra.mrb[16].mxu0 %vm32_vm2, %v588_v19 }
 0xbfb   :  { %v629_v23 = vpop.f32.mrb[16].mxu0 }
 0xbfc   :  { %636 = vst.msk [vmem:[%s899_s3] sm:$0x1] %vm635_vm8, %v629_v23  ;;  %v724_v25 = vpop.f32.mrb[17].mxu0 }
 0xbfd   :  { %v632_v26 = vpop.f32.mrb[18].mxu0 }
 0xbfe   :  { %v725_v27 = vpop.f32.mrb[19].mxu0 }
 0xbff   :  { %641 = vsyncpa [#allocation3], 1 }

</bundles_post_ra>
